<compile_context>
chip_gen: v7x
topology: tpu7x:2x2x1
jax: 0.10.0
libtpu: 0.0.40
codegen_flags: <defaults>
</compile_context>

<pallas_src>
import jax
import jax.numpy as jnp
from jax.experimental import pallas as pl
from jax.experimental.pallas import tpu as pltpu

_BN_EPS = 1e-5


def _pick_b_tile(n, h, m_target=256):
    """Images per grid step: fill the MXU M dim (~256 rows) but keep grid >= 2 if possible."""
    cap = max(1, m_target // h)
    divs = [d for d in range(1, n + 1) if n % d == 0]
    good = [d for d in divs if d <= cap and n // d >= 2]   # >=2 steps -> v7x megacore shards
    if good:
        return max(good)
    ok = [d for d in divs if d <= cap]
    return max(ok) if ok else 1


def _fill_patches(x_ref, xpad_ref, patch_ref):
    """Build the im2col patch matrix from an NCHW input tile.

    x_ref    : (B, Cin, H, W)        input tile
    xpad_ref : (B, H+2, Cin*W)       vertical-halo staging buffer (rows 0 and H+1 zero)
    patch_ref: (B*H, 3*Cin*W)        patch[b*H+h, kh*Cin*W + ci*W + j] = x[b, ci, h+kh-1, j]
    """
    b_tile, cin, h, w = x_ref.shape
    cinw = cin * w
    # Zero only the two vertical halo rows (every tile: megacore/parallel safe, cheap).
    xpad_ref[:, 0:1, :] = jnp.zeros((b_tile, 1, cinw), xpad_ref.dtype)
    xpad_ref[:, h + 1:h + 2, :] = jnp.zeros((b_tile, 1, cinw), xpad_ref.dtype)
    # Interior: Cin lane-aligned contiguous (H, W) copies per image (no width halo).
    for b in range(b_tile):
        for ci in range(cin):
            xpad_ref[b, 1:h + 1, ci * w:(ci + 1) * w] = x_ref[b, ci]
    # Patch: only 3 contiguous (H, Cin*W) row-shift copies per image (one per kh).
    for b in range(b_tile):
        for kh in range(3):
            patch_ref[b * h:(b + 1) * h, kh * cinw:(kh + 1) * cinw] = xpad_ref[b, kh:kh + h, :]


def _stats_kernel(x_ref, w3_ref, stat_ref, xpad_ref, patch_ref):
    """Pass 1: per-tile sum and sum-of-squares of the raw 3x3-conv output."""
    _fill_patches(x_ref, xpad_ref, patch_ref)
    conv = jnp.dot(patch_ref[...], w3_ref[...],
                   preferred_element_type=jnp.float32)           # (B*H, W*Cout), lane-dense
    # TODO(synk): E[x^2]-E[x]^2 in f32 is cancellative for very large N*H*W; switch to
    #             per-tile centred accumulation if used beyond small activations.
    stat_ref[0, 0:1, :] = jnp.sum(conv, axis=0, keepdims=True)
    stat_ref[0, 1:2, :] = jnp.sum(conv * conv, axis=0, keepdims=True)


def _apply_kernel(x_ref, w3_ref, w1_ref, aff_ref, out_ref, xpad_ref, patch_ref):
    """Pass 2: conv*scale+shift -> ReLU, 1x1 skip (+b1) -> ReLU, sum, lane-dense store."""
    cinw = w1_ref.shape[0]
    _fill_patches(x_ref, xpad_ref, patch_ref)
    conv = jnp.dot(patch_ref[...], w3_ref[...],
                   preferred_element_type=jnp.float32)           # (B*H, W*Cout)
    # 1x1 skip: centre-row (kh=1) slice of the patch is exactly x in (B*H, Cin*W) layout.
    skip = jnp.dot(patch_ref[:, cinw:2 * cinw], w1_ref[...],
                   preferred_element_type=jnp.float32)           # (B*H, W*Cout)
    main = jnp.maximum(conv * aff_ref[0:1, :] + aff_ref[1:2, :], 0.0)
    skipv = jnp.maximum(skip + aff_ref[2:3, :], 0.0)
    # TODO(synk): for drop_prob > 0 in training mode, add pltpu.prng_seed +
    #             pltpu.stateful_bernoulli masking with 1/(1-p) rescale.
    out_ref[...] = main + skipv                                  # (B*H, W*Cout) unmasked store


def _band_weight_3x3(w3, width):
    """(3, 3, Cin, Cout) -> (3*Cin*W, W*Cout) band-diagonal-over-width dense weight.

    D[kh*Cin*W + ci*W + j, wo*Cout + c] = w3[kh, j-wo+1, ci, c] if 0 <= j-wo+1 < 3 else 0.
    Horizontal zero-padding of the conv is implicit (out-of-range columns have no rows).
    """
    _, _, cin, cout = w3.shape
    j = jnp.arange(width)[:, None]            # input column
    wo = jnp.arange(width)[None, :]           # output column
    kw = j - wo + 1
    valid = (kw >= 0) & (kw < 3)
    kw_c = jnp.clip(kw, 0, 2)
    w3_t = jnp.transpose(w3, (0, 2, 1, 3))                         # (3, Cin, 3, Cout)
    band = jnp.where(valid[None, None, :, :, None], w3_t[:, :, kw_c, :], 0.0)
    return band.reshape(3 * cin * width, width * cout)


def _dense_over_w(w_kc, width):
    """(K, Cout) -> (K*W, W*Cout): dense[k*W + wi, wo*Cout + c] = w_kc[k, c] * (wi == wo)."""
    eye = jnp.eye(width, dtype=w_kc.dtype)
    k, cout = w_kc.shape
    return (w_kc[:, None, None, :] * eye[None, :, :, None]).reshape(k * width, width * cout)


@jax.jit
def conv_skip_block_b(x_nchw, params):
    """Forward pass of ConvSkipBlockB. x_nchw: (N, Cin, H, W) float32, NCHW in/out."""
    x = x_nchw.astype(jnp.float32)            # stays NCHW: no wrapper transpose / pad of x
    n, cin, h, w = x.shape
    cout = params["w3"].shape[-1]
    wc = w * cout
    cinw = cin * w
    m_total = n * h * w

    b_tile = _pick_b_tile(n, h)
    grid_n = n // b_tile

    # Host-side weight prep (tiny).
    # TODO(synk): for large Cin/Cout/W the band/diag dense weights outgrow v7x's 64 MiB
    #             VMEM; switch to a plain (M, 9*Cin) im2col with lane-padded channels or
    #             tile the output-column dimension, and single-buffer the constant weight
    #             blocks via pipeline_mode=pl.Buffered(1).
    # TODO(synk): on v6e/v7x cast patch scratch + dense weights to bf16 (keep f32 stats
    #             accumulation) for ~2x MXU rate if the accuracy budget allows.
    w3_band = _band_weight_3x3(params["w3"].astype(jnp.float32), w)    # (3*Cin*W, W*Cout)
    w1_dense = _dense_over_w(params["w1"].astype(jnp.float32), w)      # (Cin*W,   W*Cout)

    x_spec = pl.BlockSpec((b_tile, cin, h, w), lambda i: (i, 0, 0, 0))
    w3_spec = pl.BlockSpec((3 * cinw, wc), lambda i: (0, 0))
    scratch = [pltpu.VMEM((b_tile, h + 2, cinw), jnp.float32),   # vertical-halo staging
               pltpu.VMEM((b_tile * h, 3 * cinw), jnp.float32)]  # im2col patches
    cparams = pltpu.CompilerParams(dimension_semantics=("parallel",),
                                   vmem_limit_bytes=48 * 1024 * 1024)

    # ---- pass 1: per-tile partial sums of the raw conv output ----
    stats = pl.pallas_call(
        _stats_kernel,
        out_shape=jax.ShapeDtypeStruct((grid_n, 2, wc), jnp.float32),
        grid=(grid_n,),
        in_specs=[x_spec, w3_spec],
        out_specs=pl.BlockSpec((1, 2, wc), lambda i: (i, 0, 0)),
        scratch_shapes=scratch,
        compiler_params=cparams,
        cost_estimate=pl.CostEstimate(
            flops=2 * n * h * (3 * cinw) * wc + 4 * n * h * wc,
            transcendentals=0,
            bytes_accessed=4 * (n * cin * h * w + 3 * cinw * wc + grid_n * 2 * wc)),
    )(x, w3_band)

    # ---- global BatchNorm batch statistics (training mode) — tiny host-side math ----
    tot = jnp.sum(stats, axis=0).reshape(2, w, cout).sum(axis=1)       # (2, Cout)
    mean = tot[0] / m_total
    var = tot[1] / m_total - mean * mean                               # biased variance
    inv_std = jax.lax.rsqrt(var + _BN_EPS)
    scale = params["gamma"][0] * inv_std                               # (Cout,)
    shift = params["beta"][0] - mean * scale          # conv bias b3 cancels under train BN
    affine = jnp.stack([jnp.tile(scale, w),                            # (3, W*Cout)
                        jnp.tile(shift, w),
                        jnp.tile(params["b1"][0], w)], axis=0)

    # ---- pass 2: normalize + ReLU, 1x1 skip + ReLU, sum, lane-dense store ----
    out = pl.pallas_call(
        _apply_kernel,
        out_shape=jax.ShapeDtypeStruct((n * h, wc), jnp.float32),
        grid=(grid_n,),
        in_specs=[x_spec, w3_spec,
                  pl.BlockSpec((cinw, wc), lambda i: (0, 0)),
                  pl.BlockSpec((3, wc), lambda i: (0, 0))],
        out_specs=pl.BlockSpec((b_tile * h, wc), lambda i: (i, 0)),
        scratch_shapes=scratch,
        compiler_params=cparams,
        cost_estimate=pl.CostEstimate(
            flops=2 * n * h * (3 * cinw) * wc + 2 * n * h * cinw * wc + 8 * n * h * wc,
            transcendentals=0,
            bytes_accessed=4 * (n * cin * h * w + 4 * cinw * wc + 3 * wc + n * h * wc)),
    )(x, w3_band, w1_dense, affine)

    # (N*H, W*Cout) -> NCHW to match the PyTorch module's output layout.
    # TODO(synk): skip this transpose if the consumer can take NHWC / (N, H, W*Cout).
    return jnp.transpose(out.reshape(n, h, w, cout), (0, 3, 1, 2))


def _reference(x_nchw, params):
    """Pure-JAX reference mirroring the PyTorch module (incl. conv bias, train-mode BN)."""
    x = jnp.transpose(x_nchw, (0, 2, 3, 1)).astype(jnp.float32)
    N, H, W, Cin = x.shape
    Cout = params["w3"].shape[-1]
    xpad = jnp.pad(x, ((0, 0), (1, 1), (1, 1), (0, 0)))
    conv = jnp.zeros((N, H, W, Cout), jnp.float32)
    for kh in range(3):
        for kw in range(3):
            conv = conv + jnp.einsum(
                "nhwc,cd->nhwd", xpad[:, kh:kh + H, kw:kw + W, :], params["w3"][kh, kw])
    conv = conv + params["b3"][0]
    mean = jnp.mean(conv, axis=(0, 1, 2), keepdims=True)
    var = jnp.mean((conv - mean) ** 2, axis=(0, 1, 2), keepdims=True)
    bn = (conv - mean) * jax.lax.rsqrt(var + _BN_EPS) * params["gamma"][0] + params["beta"][0]
    main = jnp.maximum(bn, 0.0)
    skip = jnp.maximum(jnp.einsum("nhwc,cd->nhwd", x, params["w1"]) + params["b1"][0], 0.0)
    return jnp.transpose(main + skip, (0, 3, 1, 2))


if __name__ == "__main__":
    key = jax.random.PRNGKey(0)
    k_x, k_w3, k_b3, k_w1, k_b1, k_g, k_b = jax.random.split(key, 7)

    N, Cin, Cout, H, W = 2, 4, 8, 16, 16

    params = {
        "w3": jax.random.normal(k_w3, (3, 3, Cin, Cout), jnp.float32) * 0.2,
        "b3": jax.random.normal(k_b3, (1, Cout), jnp.float32) * 0.1,  # no-op under train BN
        "w1": jax.random.normal(k_w1, (Cin, Cout), jnp.float32) * 0.2,
        "b1": jax.random.normal(k_b1, (1, Cout), jnp.float32) * 0.1,
        "gamma": 1.0 + 0.1 * jax.random.normal(k_g, (1, Cout), jnp.float32),
        "beta": 0.1 * jax.random.normal(k_b, (1, Cout), jnp.float32),
    }
    x = jax.random.normal(k_x, (N, Cin, H, W), jnp.float32)

    out = jax.block_until_ready(conv_skip_block_b(x, params))
    ref = jax.block_until_ready(_reference(x, params))

    assert out.shape == (N, Cout, H, W)
    err = float(jnp.max(jnp.abs(out - ref)))
    assert jnp.allclose(out, ref, atol=2e-3, rtol=2e-3), err
    print("KERNEL_OK")
</pallas_src>

<mosaic_0001>
module attributes {stable_mosaic.version = 11 : i64} {
  func.func @_stats_kernel(%arg0: i32, %arg1: memref<1x4x16x16xf32, #tpu.memory_space<vmem>>, %arg2: memref<192x128xf32, #tpu.memory_space<vmem>>, %arg3: memref<1x2x128xf32, #tpu.memory_space<vmem>>, %arg4: memref<1x18x64xf32, #tpu.memory_space<vmem>>, %arg5: memref<16x192xf32, #tpu.memory_space<vmem>>) attributes {dimension_semantics = [#tpu.dimension_semantics<parallel>], iteration_bounds = array<i64: 2>, scalar_prefetch = 0 : i64, scratch_operands = 2 : i64, tpu.core_type = #tpu.core_type<tc>, window_params = [{transform_indices = @transform_0, window_bounds = array<i64: 1, 4, 16, 16>}, {pipeline_mode = #tpu.pipeline_mode<synchronous>, transform_indices = @transform_1, window_bounds = array<i64: 192, 128>}, {transform_indices = @transform_2, window_bounds = array<i64: 1, 2, 128>}]} {
    %cst = arith.constant 0.000000e+00 : f32
    %0 = vector.broadcast %cst : f32 to vector<1x1x64xf32>
    %c0 = arith.constant 0 : index
    %c0_0 = arith.constant 0 : index
    %c0_1 = arith.constant 0 : index
    %1 = vector.load %arg4[%c0, %c0_0, %c0_1] : memref<1x18x64xf32, #tpu.memory_space<vmem>>, vector<1x1x64xf32>
    tpu.vector_store %arg4[%c0, %c0_0, %c0_1], %0 {strides = array<i32>} : memref<1x18x64xf32, #tpu.memory_space<vmem>>, vector<1x1x64xf32>,
    %cst_2 = arith.constant 0.000000e+00 : f32
    %2 = vector.broadcast %cst_2 : f32 to vector<1x1x64xf32>
    %c0_3 = arith.constant 0 : index
    %c17 = arith.constant 17 : index
    %c0_4 = arith.constant 0 : index
    %3 = vector.load %arg4[%c0_3, %c17, %c0_4] : memref<1x18x64xf32, #tpu.memory_space<vmem>>, vector<1x1x64xf32>
    tpu.vector_store %arg4[%c0_3, %c17, %c0_4], %2 {strides = array<i32>} : memref<1x18x64xf32, #tpu.memory_space<vmem>>, vector<1x1x64xf32>,
    %c0_5 = arith.constant 0 : index
    %c0_6 = arith.constant 0 : index
    %c0_7 = arith.constant 0 : index
    %c0_8 = arith.constant 0 : index
    %4 = vector.load %arg1[%c0_5, %c0_6, %c0_7, %c0_8] : memref<1x4x16x16xf32, #tpu.memory_space<vmem>>, vector<1x1x16x16xf32>
    %5 = vector.shape_cast %4 : vector<1x1x16x16xf32> to vector<16x16xf32>
    %c0_9 = arith.constant 0 : index
    %c1 = arith.constant 1 : index
    %c0_10 = arith.constant 0 : index
    %6 = vector.load %arg4[%c0_9, %c1, %c0_10] : memref<1x18x64xf32, #tpu.memory_space<vmem>>, vector<1x16x16xf32>
    %7 = vector.shape_cast %6 : vector<1x16x16xf32> to vector<16x16xf32>
    %8 = vector.shape_cast %5 : vector<16x16xf32> to vector<1x16x16xf32>
    tpu.vector_store %arg4[%c0_9, %c1, %c0_10], %8 {strides = array<i32>} : memref<1x18x64xf32, #tpu.memory_space<vmem>>, vector<1x16x16xf32>,
    %c0_11 = arith.constant 0 : index
    %c1_12 = arith.constant 1 : index
    %c0_13 = arith.constant 0 : index
    %c0_14 = arith.constant 0 : index
    %9 = vector.load %arg1[%c0_11, %c1_12, %c0_13, %c0_14] : memref<1x4x16x16xf32, #tpu.memory_space<vmem>>, vector<1x1x16x16xf32>
    %10 = vector.shape_cast %9 : vector<1x1x16x16xf32> to vector<16x16xf32>
    %c0_15 = arith.constant 0 : index
    %c1_16 = arith.constant 1 : index
    %c16 = arith.constant 16 : index
    %11 = vector.load %arg4[%c0_15, %c1_16, %c16] : memref<1x18x64xf32, #tpu.memory_space<vmem>>, vector<1x16x16xf32>
    %12 = vector.shape_cast %11 : vector<1x16x16xf32> to vector<16x16xf32>
    %13 = vector.shape_cast %10 : vector<16x16xf32> to vector<1x16x16xf32>
    tpu.vector_store %arg4[%c0_15, %c1_16, %c16], %13 {strides = array<i32>} : memref<1x18x64xf32, #tpu.memory_space<vmem>>, vector<1x16x16xf32>,
    %c0_17 = arith.constant 0 : index
    %c2 = arith.constant 2 : index
    %c0_18 = arith.constant 0 : index
    %c0_19 = arith.constant 0 : index
    %14 = vector.load %arg1[%c0_17, %c2, %c0_18, %c0_19] : memref<1x4x16x16xf32, #tpu.memory_space<vmem>>, vector<1x1x16x16xf32>
    %15 = vector.shape_cast %14 : vector<1x1x16x16xf32> to vector<16x16xf32>
    %c0_20 = arith.constant 0 : index
    %c1_21 = arith.constant 1 : index
    %c32 = arith.constant 32 : index
    %16 = vector.load %arg4[%c0_20, %c1_21, %c32] : memref<1x18x64xf32, #tpu.memory_space<vmem>>, vector<1x16x16xf32>
    %17 = vector.shape_cast %16 : vector<1x16x16xf32> to vector<16x16xf32>
    %18 = vector.shape_cast %15 : vector<16x16xf32> to vector<1x16x16xf32>
    tpu.vector_store %arg4[%c0_20, %c1_21, %c32], %18 {strides = array<i32>} : memref<1x18x64xf32, #tpu.memory_space<vmem>>, vector<1x16x16xf32>,
    %c0_22 = arith.constant 0 : index
    %c3 = arith.constant 3 : index
    %c0_23 = arith.constant 0 : index
    %c0_24 = arith.constant 0 : index
    %19 = vector.load %arg1[%c0_22, %c3, %c0_23, %c0_24] : memref<1x4x16x16xf32, #tpu.memory_space<vmem>>, vector<1x1x16x16xf32>
    %20 = vector.shape_cast %19 : vector<1x1x16x16xf32> to vector<16x16xf32>
    %c0_25 = arith.constant 0 : index
    %c1_26 = arith.constant 1 : index
    %c48 = arith.constant 48 : index
    %21 = vector.load %arg4[%c0_25, %c1_26, %c48] : memref<1x18x64xf32, #tpu.memory_space<vmem>>, vector<1x16x16xf32>
    %22 = vector.shape_cast %21 : vector<1x16x16xf32> to vector<16x16xf32>
    %23 = vector.shape_cast %20 : vector<16x16xf32> to vector<1x16x16xf32>
    tpu.vector_store %arg4[%c0_25, %c1_26, %c48], %23 {strides = array<i32>} : memref<1x18x64xf32, #tpu.memory_space<vmem>>, vector<1x16x16xf32>,
    %c0_27 = arith.constant 0 : index
    %c0_28 = arith.constant 0 : index
    %c0_29 = arith.constant 0 : index
    %24 = vector.load %arg4[%c0_27, %c0_28, %c0_29] : memref<1x18x64xf32, #tpu.memory_space<vmem>>, vector<1x16x64xf32>
    %25 = vector.shape_cast %24 : vector<1x16x64xf32> to vector<16x64xf32>
    %c0_30 = arith.constant 0 : index
    %c0_31 = arith.constant 0 : index
    %26 = vector.load %arg5[%c0_30, %c0_31] : memref<16x192xf32, #tpu.memory_space<vmem>>, vector<16x64xf32>
    tpu.vector_store %arg5[%c0_30, %c0_31], %25 {strides = array<i32>} : memref<16x192xf32, #tpu.memory_space<vmem>>, vector<16x64xf32>,
    %c0_32 = arith.constant 0 : index
    %c1_33 = arith.constant 1 : index
    %c0_34 = arith.constant 0 : index
    %27 = vector.load %arg4[%c0_32, %c1_33, %c0_34] : memref<1x18x64xf32, #tpu.memory_space<vmem>>, vector<1x16x64xf32>
    %28 = vector.shape_cast %27 : vector<1x16x64xf32> to vector<16x64xf32>
    %c0_35 = arith.constant 0 : index
    %c64 = arith.constant 64 : index
    %29 = vector.load %arg5[%c0_35, %c64] : memref<16x192xf32, #tpu.memory_space<vmem>>, vector<16x64xf32>
    tpu.vector_store %arg5[%c0_35, %c64], %28 {strides = array<i32>} : memref<16x192xf32, #tpu.memory_space<vmem>>, vector<16x64xf32>,
    %c0_36 = arith.constant 0 : index
    %c2_37 = arith.constant 2 : index
    %c0_38 = arith.constant 0 : index
    %30 = vector.load %arg4[%c0_36, %c2_37, %c0_38] : memref<1x18x64xf32, #tpu.memory_space<vmem>>, vector<1x16x64xf32>
    %31 = vector.shape_cast %30 : vector<1x16x64xf32> to vector<16x64xf32>
    %c0_39 = arith.constant 0 : index
    %c128 = arith.constant 128 : index
    %32 = vector.load %arg5[%c0_39, %c128] : memref<16x192xf32, #tpu.memory_space<vmem>>, vector<16x64xf32>
    tpu.vector_store %arg5[%c0_39, %c128], %31 {strides = array<i32>} : memref<16x192xf32, #tpu.memory_space<vmem>>, vector<16x64xf32>,
    %c0_40 = arith.constant 0 : index
    %c0_41 = arith.constant 0 : index
    %33 = vector.load %arg5[%c0_40, %c0_41] : memref<16x192xf32, #tpu.memory_space<vmem>>, vector<16x192xf32>
    %c0_42 = arith.constant 0 : index
    %c0_43 = arith.constant 0 : index
    %34 = vector.load %arg2[%c0_42, %c0_43] : memref<192x128xf32, #tpu.memory_space<vmem>>, vector<192x128xf32>
    %cst_44 = arith.constant dense<0.000000e+00> : vector<16x128xf32>
    %35 = tpu.matmul %33, %34, %cst_44 {dimension_numbers = #tpu.dot_dimension_numbers<[1], [0], [0], [1], [0, 0, 1, 1], [], []>} : vector<16x192xf32>, vector<192x128xf32>, vector<16x128xf32> -> vector<16x128xf32>
    %cst_45 = arith.constant dense<0.000000e+00> : vector<128xf32>
    %36 = vector.multi_reduction <add>, %35, %cst_45 [0] : vector<16x128xf32> to vector<128xf32>
    %37 = vector.shape_cast %36 : vector<128xf32> to vector<1x128xf32>
    %c0_46 = arith.constant 0 : index
    %c0_47 = arith.constant 0 : index
    %c0_48 = arith.constant 0 : index
    %38 = vector.load %arg3[%c0_46, %c0_47, %c0_48] : memref<1x2x128xf32, #tpu.memory_space<vmem>>, vector<1x1x128xf32>
    %39 = vector.shape_cast %38 : vector<1x1x128xf32> to vector<1x128xf32>
    %40 = vector.shape_cast %37 : vector<1x128xf32> to vector<1x1x128xf32>
    tpu.vector_store %arg3[%c0_46, %c0_47, %c0_48], %40 {strides = array<i32>} : memref<1x2x128xf32, #tpu.memory_space<vmem>>, vector<1x1x128xf32>,
    %41 = arith.mulf %35, %35 : vector<16x128xf32>
    %cst_49 = arith.constant dense<0.000000e+00> : vector<128xf32>
    %42 = vector.multi_reduction <add>, %41, %cst_49 [0] : vector<16x128xf32> to vector<128xf32>
    %43 = vector.shape_cast %42 : vector<128xf32> to vector<1x128xf32>
    %c0_50 = arith.constant 0 : index
    %c1_51 = arith.constant 1 : index
    %c0_52 = arith.constant 0 : index
    %44 = vector.load %arg3[%c0_50, %c1_51, %c0_52] : memref<1x2x128xf32, #tpu.memory_space<vmem>>, vector<1x1x128xf32>
    %45 = vector.shape_cast %44 : vector<1x1x128xf32> to vector<1x128xf32>
    %46 = vector.shape_cast %43 : vector<1x128xf32> to vector<1x1x128xf32>
    tpu.vector_store %arg3[%c0_50, %c1_51, %c0_52], %46 {strides = array<i32>} : memref<1x2x128xf32, #tpu.memory_space<vmem>>, vector<1x1x128xf32>,
    return
  }
  func.func @transform_0(%arg0: i32) -> (i32, i32, i32, i32) {
    %c0_i32 = arith.constant 0 : i32
    %c0_i32_0 = arith.constant 0 : i32
    %c0_i32_1 = arith.constant 0 : i32
    %c0_i32_2 = arith.constant 0 : i32
    return %arg0, %c0_i32, %c0_i32_0, %c0_i32_1 : i32, i32, i32, i32
  }
  func.func @transform_1(%arg0: i32) -> (i32, i32) {
    %c0_i32 = arith.constant 0 : i32
    %c0_i32_0 = arith.constant 0 : i32
    %c0_i32_1 = arith.constant 0 : i32
    return %c0_i32, %c0_i32_0 : i32, i32
  }
  func.func @transform_2(%arg0: i32) -> (i32, i32, i32) {
    %c0_i32 = arith.constant 0 : i32
    %c0_i32_0 = arith.constant 0 : i32
    %c0_i32_1 = arith.constant 0 : i32
    return %arg0, %c0_i32, %c0_i32_0 : i32, i32, i32
  }
}

module attributes {stable_mosaic.version = 11 : i64} {
  func.func @_apply_kernel(%arg0: i32, %arg1: memref<1x4x16x16xf32, #tpu.memory_space<vmem>>, %arg2: memref<192x128xf32, #tpu.memory_space<vmem>>, %arg3: memref<64x128xf32, #tpu.memory_space<vmem>>, %arg4: memref<3x128xf32, #tpu.memory_space<vmem>>, %arg5: memref<16x128xf32, #tpu.memory_space<vmem>>, %arg6: memref<1x18x64xf32, #tpu.memory_space<vmem>>, %arg7: memref<16x192xf32, #tpu.memory_space<vmem>>) attributes {dimension_semantics = [#tpu.dimension_semantics<parallel>], iteration_bounds = array<i64: 2>, scalar_prefetch = 0 : i64, scratch_operands = 2 : i64, tpu.core_type = #tpu.core_type<tc>, window_params = [{transform_indices = @transform_0, window_bounds = array<i64: 1, 4, 16, 16>}, {pipeline_mode = #tpu.pipeline_mode<synchronous>, transform_indices = @transform_1, window_bounds = array<i64: 192, 128>}, {pipeline_mode = #tpu.pipeline_mode<synchronous>, transform_indices = @transform_2, window_bounds = array<i64: 64, 128>}, {pipeline_mode = #tpu.pipeline_mode<synchronous>, transform_indices = @transform_3, window_bounds = array<i64: 3, 128>}, {transform_indices = @transform_4, window_bounds = array<i64: 16, 128>}]} {
    %cst = arith.constant 0.000000e+00 : f32
    %0 = vector.broadcast %cst : f32 to vector<1x1x64xf32>
    %c0 = arith.constant 0 : index
    %c0_0 = arith.constant 0 : index
    %c0_1 = arith.constant 0 : index
    %1 = vector.load %arg6[%c0, %c0_0, %c0_1] : memref<1x18x64xf32, #tpu.memory_space<vmem>>, vector<1x1x64xf32>
    tpu.vector_store %arg6[%c0, %c0_0, %c0_1], %0 {strides = array<i32>} : memref<1x18x64xf32, #tpu.memory_space<vmem>>, vector<1x1x64xf32>,
    %cst_2 = arith.constant 0.000000e+00 : f32
    %2 = vector.broadcast %cst_2 : f32 to vector<1x1x64xf32>
    %c0_3 = arith.constant 0 : index
    %c17 = arith.constant 17 : index
    %c0_4 = arith.constant 0 : index
    %3 = vector.load %arg6[%c0_3, %c17, %c0_4] : memref<1x18x64xf32, #tpu.memory_space<vmem>>, vector<1x1x64xf32>
    tpu.vector_store %arg6[%c0_3, %c17, %c0_4], %2 {strides = array<i32>} : memref<1x18x64xf32, #tpu.memory_space<vmem>>, vector<1x1x64xf32>,
    %c0_5 = arith.constant 0 : index
    %c0_6 = arith.constant 0 : index
    %c0_7 = arith.constant 0 : index
    %c0_8 = arith.constant 0 : index
    %4 = vector.load %arg1[%c0_5, %c0_6, %c0_7, %c0_8] : memref<1x4x16x16xf32, #tpu.memory_space<vmem>>, vector<1x1x16x16xf32>
    %5 = vector.shape_cast %4 : vector<1x1x16x16xf32> to vector<16x16xf32>
    %c0_9 = arith.constant 0 : index
    %c1 = arith.constant 1 : index
    %c0_10 = arith.constant 0 : index
    %6 = vector.load %arg6[%c0_9, %c1, %c0_10] : memref<1x18x64xf32, #tpu.memory_space<vmem>>, vector<1x16x16xf32>
    %7 = vector.shape_cast %6 : vector<1x16x16xf32> to vector<16x16xf32>
    %8 = vector.shape_cast %5 : vector<16x16xf32> to vector<1x16x16xf32>
    tpu.vector_store %arg6[%c0_9, %c1, %c0_10], %8 {strides = array<i32>} : memref<1x18x64xf32, #tpu.memory_space<vmem>>, vector<1x16x16xf32>,
    %c0_11 = arith.constant 0 : index
    %c1_12 = arith.constant 1 : index
    %c0_13 = arith.constant 0 : index
    %c0_14 = arith.constant 0 : index
    %9 = vector.load %arg1[%c0_11, %c1_12, %c0_13, %c0_14] : memref<1x4x16x16xf32, #tpu.memory_space<vmem>>, vector<1x1x16x16xf32>
    %10 = vector.shape_cast %9 : vector<1x1x16x16xf32> to vector<16x16xf32>
    %c0_15 = arith.constant 0 : index
    %c1_16 = arith.constant 1 : index
    %c16 = arith.constant 16 : index
    %11 = vector.load %arg6[%c0_15, %c1_16, %c16] : memref<1x18x64xf32, #tpu.memory_space<vmem>>, vector<1x16x16xf32>
    %12 = vector.shape_cast %11 : vector<1x16x16xf32> to vector<16x16xf32>
    %13 = vector.shape_cast %10 : vector<16x16xf32> to vector<1x16x16xf32>
    tpu.vector_store %arg6[%c0_15, %c1_16, %c16], %13 {strides = array<i32>} : memref<1x18x64xf32, #tpu.memory_space<vmem>>, vector<1x16x16xf32>,
    %c0_17 = arith.constant 0 : index
    %c2 = arith.constant 2 : index
    %c0_18 = arith.constant 0 : index
    %c0_19 = arith.constant 0 : index
    %14 = vector.load %arg1[%c0_17, %c2, %c0_18, %c0_19] : memref<1x4x16x16xf32, #tpu.memory_space<vmem>>, vector<1x1x16x16xf32>
    %15 = vector.shape_cast %14 : vector<1x1x16x16xf32> to vector<16x16xf32>
    %c0_20 = arith.constant 0 : index
    %c1_21 = arith.constant 1 : index
    %c32 = arith.constant 32 : index
    %16 = vector.load %arg6[%c0_20, %c1_21, %c32] : memref<1x18x64xf32, #tpu.memory_space<vmem>>, vector<1x16x16xf32>
    %17 = vector.shape_cast %16 : vector<1x16x16xf32> to vector<16x16xf32>
    %18 = vector.shape_cast %15 : vector<16x16xf32> to vector<1x16x16xf32>
    tpu.vector_store %arg6[%c0_20, %c1_21, %c32], %18 {strides = array<i32>} : memref<1x18x64xf32, #tpu.memory_space<vmem>>, vector<1x16x16xf32>,
    %c0_22 = arith.constant 0 : index
    %c3 = arith.constant 3 : index
    %c0_23 = arith.constant 0 : index
    %c0_24 = arith.constant 0 : index
    %19 = vector.load %arg1[%c0_22, %c3, %c0_23, %c0_24] : memref<1x4x16x16xf32, #tpu.memory_space<vmem>>, vector<1x1x16x16xf32>
    %20 = vector.shape_cast %19 : vector<1x1x16x16xf32> to vector<16x16xf32>
    %c0_25 = arith.constant 0 : index
    %c1_26 = arith.constant 1 : index
    %c48 = arith.constant 48 : index
    %21 = vector.load %arg6[%c0_25, %c1_26, %c48] : memref<1x18x64xf32, #tpu.memory_space<vmem>>, vector<1x16x16xf32>
    %22 = vector.shape_cast %21 : vector<1x16x16xf32> to vector<16x16xf32>
    %23 = vector.shape_cast %20 : vector<16x16xf32> to vector<1x16x16xf32>
    tpu.vector_store %arg6[%c0_25, %c1_26, %c48], %23 {strides = array<i32>} : memref<1x18x64xf32, #tpu.memory_space<vmem>>, vector<1x16x16xf32>,
    %c0_27 = arith.constant 0 : index
    %c0_28 = arith.constant 0 : index
    %c0_29 = arith.constant 0 : index
    %24 = vector.load %arg6[%c0_27, %c0_28, %c0_29] : memref<1x18x64xf32, #tpu.memory_space<vmem>>, vector<1x16x64xf32>
    %25 = vector.shape_cast %24 : vector<1x16x64xf32> to vector<16x64xf32>
    %c0_30 = arith.constant 0 : index
    %c0_31 = arith.constant 0 : index
    %26 = vector.load %arg7[%c0_30, %c0_31] : memref<16x192xf32, #tpu.memory_space<vmem>>, vector<16x64xf32>
    tpu.vector_store %arg7[%c0_30, %c0_31], %25 {strides = array<i32>} : memref<16x192xf32, #tpu.memory_space<vmem>>, vector<16x64xf32>,
    %c0_32 = arith.constant 0 : index
    %c1_33 = arith.constant 1 : index
    %c0_34 = arith.constant 0 : index
    %27 = vector.load %arg6[%c0_32, %c1_33, %c0_34] : memref<1x18x64xf32, #tpu.memory_space<vmem>>, vector<1x16x64xf32>
    %28 = vector.shape_cast %27 : vector<1x16x64xf32> to vector<16x64xf32>
    %c0_35 = arith.constant 0 : index
    %c64 = arith.constant 64 : index
    %29 = vector.load %arg7[%c0_35, %c64] : memref<16x192xf32, #tpu.memory_space<vmem>>, vector<16x64xf32>
    tpu.vector_store %arg7[%c0_35, %c64], %28 {strides = array<i32>} : memref<16x192xf32, #tpu.memory_space<vmem>>, vector<16x64xf32>,
    %c0_36 = arith.constant 0 : index
    %c2_37 = arith.constant 2 : index
    %c0_38 = arith.constant 0 : index
    %30 = vector.load %arg6[%c0_36, %c2_37, %c0_38] : memref<1x18x64xf32, #tpu.memory_space<vmem>>, vector<1x16x64xf32>
    %31 = vector.shape_cast %30 : vector<1x16x64xf32> to vector<16x64xf32>
    %c0_39 = arith.constant 0 : index
    %c128 = arith.constant 128 : index
    %32 = vector.load %arg7[%c0_39, %c128] : memref<16x192xf32, #tpu.memory_space<vmem>>, vector<16x64xf32>
    tpu.vector_store %arg7[%c0_39, %c128], %31 {strides = array<i32>} : memref<16x192xf32, #tpu.memory_space<vmem>>, vector<16x64xf32>,
    %c0_40 = arith.constant 0 : index
    %c0_41 = arith.constant 0 : index
    %33 = vector.load %arg7[%c0_40, %c0_41] : memref<16x192xf32, #tpu.memory_space<vmem>>, vector<16x192xf32>
    %c0_42 = arith.constant 0 : index
    %c0_43 = arith.constant 0 : index
    %34 = vector.load %arg2[%c0_42, %c0_43] : memref<192x128xf32, #tpu.memory_space<vmem>>, vector<192x128xf32>
    %cst_44 = arith.constant dense<0.000000e+00> : vector<16x128xf32>
    %35 = tpu.matmul %33, %34, %cst_44 {dimension_numbers = #tpu.dot_dimension_numbers<[1], [0], [0], [1], [0, 0, 1, 1], [], []>} : vector<16x192xf32>, vector<192x128xf32>, vector<16x128xf32> -> vector<16x128xf32>
    %c0_45 = arith.constant 0 : index
    %c64_46 = arith.constant 64 : index
    %36 = vector.load %arg7[%c0_45, %c64_46] : memref<16x192xf32, #tpu.memory_space<vmem>>, vector<16x64xf32>
    %c0_47 = arith.constant 0 : index
    %c0_48 = arith.constant 0 : index
    %37 = vector.load %arg3[%c0_47, %c0_48] : memref<64x128xf32, #tpu.memory_space<vmem>>, vector<64x128xf32>
    %cst_49 = arith.constant dense<0.000000e+00> : vector<16x128xf32>
    %38 = tpu.matmul %36, %37, %cst_49 {dimension_numbers = #tpu.dot_dimension_numbers<[1], [0], [0], [1], [0, 0, 1, 1], [], []>} : vector<16x64xf32>, vector<64x128xf32>, vector<16x128xf32> -> vector<16x128xf32>
    %c0_50 = arith.constant 0 : index
    %c0_51 = arith.constant 0 : index
    %39 = vector.load %arg4[%c0_50, %c0_51] : memref<3x128xf32, #tpu.memory_space<vmem>>, vector<1x128xf32>
    %40 = vector.broadcast %39 : vector<1x128xf32> to vector<16x128xf32>
    %41 = arith.mulf %35, %40 : vector<16x128xf32>
    %c1_52 = arith.constant 1 : index
    %c0_53 = arith.constant 0 : index
    %42 = vector.load %arg4[%c1_52, %c0_53] : memref<3x128xf32, #tpu.memory_space<vmem>>, vector<1x128xf32>
    %43 = vector.broadcast %42 : vector<1x128xf32> to vector<16x128xf32>
    %44 = arith.addf %41, %43 : vector<16x128xf32>
    %cst_54 = arith.constant 0.000000e+00 : f32
    %45 = vector.broadcast %cst_54 : f32 to vector<16x128xf32>
    %46 = arith.maximumf %44, %45 : vector<16x128xf32>
    %c2_55 = arith.constant 2 : index
    %c0_56 = arith.constant 0 : index
    %47 = vector.load %arg4[%c2_55, %c0_56] : memref<3x128xf32, #tpu.memory_space<vmem>>, vector<1x128xf32>
    %48 = vector.broadcast %47 : vector<1x128xf32> to vector<16x128xf32>
    %49 = arith.addf %38, %48 : vector<16x128xf32>
    %cst_57 = arith.constant 0.000000e+00 : f32
    %50 = vector.broadcast %cst_57 : f32 to vector<16x128xf32>
    %51 = arith.maximumf %49, %50 : vector<16x128xf32>
    %52 = arith.addf %46, %51 : vector<16x128xf32>
    %c0_58 = arith.constant 0 : index
    %c0_59 = arith.constant 0 : index
    %53 = vector.load %arg5[%c0_58, %c0_59] : memref<16x128xf32, #tpu.memory_space<vmem>>, vector<16x128xf32>
    tpu.vector_store %arg5[%c0_58, %c0_59], %52 {strides = array<i32>} : memref<16x128xf32, #tpu.memory_space<vmem>>, vector<16x128xf32>,
    return
  }
  func.func @transform_0(%arg0: i32) -> (i32, i32, i32, i32) {
    %c0_i32 = arith.constant 0 : i32
    %c0_i32_0 = arith.constant 0 : i32
    %c0_i32_1 = arith.constant 0 : i32
    %c0_i32_2 = arith.constant 0 : i32
    return %arg0, %c0_i32, %c0_i32_0, %c0_i32_1 : i32, i32, i32, i32
  }
  func.func @transform_1(%arg0: i32) -> (i32, i32) {
    %c0_i32 = arith.constant 0 : i32
    %c0_i32_0 = arith.constant 0 : i32
    %c0_i32_1 = arith.constant 0 : i32
    return %c0_i32, %c0_i32_0 : i32, i32
  }
  func.func @transform_2(%arg0: i32) -> (i32, i32) {
    %c0_i32 = arith.constant 0 : i32
    %c0_i32_0 = arith.constant 0 : i32
    %c0_i32_1 = arith.constant 0 : i32
    return %c0_i32, %c0_i32_0 : i32, i32
  }
  func.func @transform_3(%arg0: i32) -> (i32, i32) {
    %c0_i32 = arith.constant 0 : i32
    %c0_i32_0 = arith.constant 0 : i32
    %c0_i32_1 = arith.constant 0 : i32
    return %c0_i32, %c0_i32_0 : i32, i32
  }
  func.func @transform_4(%arg0: i32) -> (i32, i32) {
    %c0_i32 = arith.constant 0 : i32
    %c0_i32_0 = arith.constant 0 : i32
    return %arg0, %c0_i32 : i32, i32
  }
}

</mosaic_0001>

<bundles_post_ra>
// kernel: conv_skip_block_b.2
= control target key start
LH: loop header
LB: loop body
LE: loop exit
PB: predicated region body
PF: predicated region fallthrough
CT: control target
= control target key end

     0   :  { %s516_s9 = smov 0   ;;  %s639_s0 = inlined_call_operand.vmem [shape: f32[2,4,16,16], index: 0, kind: input, shape index: {}]   ;;  %s640_s1 = inlined_call_operand.vmem [shape: f32[192,128], index: 1, kind: input, shape index: {}]   ;;  %s641_s2 = inlined_call_operand.vmem [shape: f32[2,2,128], index: 2, kind: output, shape index: {}]  }
   0x1 LB: > { %s394_s10 = sadd.s32 4294967295, %s493_s9   ;;  %p398_p0 = scmp.ge.s32.totalorder %s493_s9, 1  ;;  %s493_s9 = sphi %s516_s9, %s12_s9  }
   0x2   : > { %p112_p1 = scmp.lt.s32.totalorder %s493_s9, 3 }
   0x4   : > { %p113_p2 = pnand %p398_p0, %p112_p1 }
   0x5   : > { %p133_p3 = scmp.lt.s32.totalorder (!%p113_p2), %s394_s10, 1  ;;  %vm142_vm0 = vcmask (!%p113_p2), 516096   ;;  %v495_v0 = vmov (!%p113_p2), 0.0   ;;  %vm147_vm1 = vcmask (!%p113_p2), 130048   ;;  %s496_s15 = smov (!%p113_p2), 32   ;;  %v218_v9 = vld [vmem:[%s640_s1] sm:$0xff] (!%p113_p2) }
   0x6   : > { %116 = sbr.rel (%p113_p2) target bundleno = 500 (0x1f4), region = 28  ;;  %144 = vst.msk [vmem:[#allocation2 + $0x11] sm:$0x1] (!%p113_p2), %vm142_vm0, %v495_v0  ;;  %143 = vst.msk [vmem:[#allocation2] sm:$0x1] (!%p113_p2), %vm142_vm0, %v495_v0  ;;  %s497_s16 = smov (!%p113_p2), 16  }
   0x7   : > { %s498_s17 = smov (!%p113_p2), 48   ;;  %v219_v10 = vld [vmem:[%s640_s1 + $0x8] sm:$0xff] (!%p113_p2)  ;;  %v220_v11 = vld [vmem:[%s640_s1 + $0x10] sm:$0xff] (!%p113_p2)  ;;  %v499_v12 = vmov (!%p113_p2), 0.0|0.0   ;;  %v221_v14 = vld [vmem:[%s640_s1 + $0x18] sm:$0xff] (!%p113_p2)  ;;  %vm161_vm2 = vcmask (!%p113_p2), 261248  }
   0x8   : > { %413 = vmatprep.subr.bf16.mxu0 (!%p113_p2), %v499_v12  ;;  %449 = vmatprep.subr.bf16.mxu1 (!%p113_p2), %v499_v12  ;;  %v414_v13 = vpack.c.bf16 (!%p113_p2), %v219_v10, %v218_v9  ;;  %v417_v15 = vpack.c.bf16 (!%p113_p2), %v221_v14, %v220_v11  ;;  %v222_v16 = vld [vmem:[%s640_s1 + $0x20] sm:$0xff] (!%p113_p2)  ;;  %v223_v17 = vld [vmem:[%s640_s1 + $0x28] sm:$0xff] (!%p113_p2)  ;;  %v224_v19 = vld [vmem:[%s640_s1 + $0x30] sm:$0xff] (!%p113_p2)  ;;  %vm175_vm3 = vcmask (!%p113_p2), 392448   ;;  %vm189_vm4 = vcmask (!%p113_p2), 523648  }
   0x9   : > { %v420_v18 = vpack.c.bf16 (!%p113_p2), %v223_v17, %v222_v16  ;;  %v225_v20 = vld [vmem:[%s640_s1 + $0x38] sm:$0xff] (!%p113_p2)  ;;  %v226_v22 = vld [vmem:[%s640_s1 + $0x40] sm:$0xff] (!%p113_p2)  ;;  %v227_v23 = vld [vmem:[%s640_s1 + $0x48] sm:$0xff] (!%p113_p2)  ;;  %vm194_vm5 = vcmask (!%p113_p2), 523264   ;;  %vm207_vm6 = vcmask (!%p113_p2), 1048064  }
   0xa   : > { %415 = vmatpush1.bf16.msra.mxu0 (!%p113_p2), %v414_v13  ;;  %461 = vmatpush1.bf16.msra.mxu1 (!%p113_p2), %v414_v13  ;;  %v423_v21 = vpack.c.bf16 (!%p113_p2), %v225_v20, %v224_v19  ;;  %v426_v24 = vpack.c.bf16 (!%p113_p2), %v227_v23, %v226_v22  ;;  %v228_v25 = vld [vmem:[%s640_s1 + $0x50] sm:$0xff] (!%p113_p2)  ;;  %v229_v26 = vld [vmem:[%s640_s1 + $0x58] sm:$0xff] (!%p113_p2)  ;;  %v230_v28 = vld [vmem:[%s640_s1 + $0x60] sm:$0xff] (!%p113_p2) }
   0xb   : > { %416 = vmatprep.subr.bf16.mxu0 (!%p113_p2), %v499_v12  ;;  %450 = vmatprep.subr.bf16.mxu1 (!%p113_p2), %v499_v12  ;;  %v429_v27 = vpack.c.bf16 (!%p113_p2), %v229_v26, %v228_v25  ;;  %v231_v29 = vld [vmem:[%s640_s1 + $0x68] sm:$0xff] (!%p113_p2)  ;;  %v232_v31 = vld [vmem:[%s640_s1 + $0x70] sm:$0xff] (!%p113_p2)  ;;  %v233_v32 = vld [vmem:[%s640_s1 + $0x78] sm:$0xff] (!%p113_p2) }
   0xc   : > { %v432_v30 = vpack.c.bf16 (!%p113_p2), %v231_v29, %v230_v28  ;;  %v435_v33 = vpack.c.bf16 (!%p113_p2), %v233_v32, %v232_v31  ;;  %v234_v34 = vld [vmem:[%s640_s1 + $0x80] sm:$0xff] (!%p113_p2)  ;;  %v235_v35 = vld [vmem:[%s640_s1 + $0x88] sm:$0xff] (!%p113_p2)  ;;  %v236_v37 = vld [vmem:[%s640_s1 + $0x90] sm:$0xff] (!%p113_p2) }
   0xd   : > { %s643_s10 = smov (!%p133_p3, %s394_s10), 1  ;;  %v438_v36 = vpack.c.bf16 %v235_v35, %v234_v34  ;;  %v237_v38 = vld [vmem:[%s640_s1 + $0x98] sm:$0xff]  ;;  %v238_v42 = vld [vmem:[%s640_s1 + $0xa0] sm:$0xff]  ;;  %v239_v43 = vld [vmem:[%s640_s1 + $0xa8] sm:$0xff] }
   0xe   : > { %s412_s11 = sshll.u32 %s643_s10, 6  ;;  %418 = vmatpush1.bf16.msra.mxu0 %v417_v15  ;;  %462 = vmatpush1.bf16.msra.mxu1 %v417_v15  ;;  %v441_v39 = vpack.c.bf16 %v237_v38, %v236_v37  ;;  %v444_v46 = vpack.c.bf16 %v239_v43, %v238_v42  ;;  %v240_v47 = vld [vmem:[%s640_s1 + $0xb0] sm:$0xff]  ;;  %v241_v48 = vld [vmem:[%s640_s1 + $0xb8] sm:$0xff] }
   0xf   : > { %s137_s14 = scalar_lea.vmem %s639_s0, %s412_s11  ;;  %419 = vmatprep.subr.bf16.mxu0 %v499_v12  ;;  %451 = vmatprep.subr.bf16.mxu1 %v499_v12  ;;  %v447_v49 = vpack.c.bf16 %v241_v48, %v240_v47 }
  0x10   : > { %v404_v1 = vld [vmem:[%s137_s14 + $0x20] sm:$0xff]  ;;  %v402_v2 = vld [vmem:[%s137_s14 + $0x10] sm:$0xff]  ;;  %v405_v3 = vld [vmem:[%s137_s14 + $0x28] sm:$0xff] }
  0x11   : > { %169 = vrot.lane.b32.xlu1 %v404_v1, %s496_s15  ;;  %155 = vrot.lane.b32.xlu0 %v402_v2, %s497_s16  ;;  %v403_v4 = vld [vmem:[%s137_s14 + $0x18] sm:$0xff]  ;;  %v145_v5 = vld [vmem:[%s137_s14] sm:$0xff] }
  0x12   : > { %v146_v6 = vld [vmem:[%s137_s14 + $0x8] sm:$0xff]  ;;  %148 = vst.msk [vmem:[#allocation2 + $0x1] sm:$0xff] %vm147_vm1, %v145_v5  ;;  %v407_v7 = vld [vmem:[%s137_s14 + $0x38] sm:$0xff]  ;;  %v406_v8 = vld [vmem:[%s137_s14 + $0x30] sm:$0xff]  ;;  %421 = vmatpush1.bf16.msra.mxu0 %v420_v18  ;;  %463 = vmatpush1.bf16.msra.mxu1 %v420_v18  ;;  %s500_s14 = smov 64  }
  0x13   : > { %149 = vst.msk [vmem:[#allocation2 + $0x9] sm:$0xff] %vm147_vm1, %v146_v6  ;;  %422 = vmatprep.subr.bf16.mxu0 %v499_v12  ;;  %452 = vmatprep.subr.bf16.mxu1 %v499_v12 }
  0x15   : > { %171 = vrot.lane.b32.xlu1 %v405_v3, %s496_s15  ;;  %157 = vrot.lane.b32.xlu0 %v403_v4, %s497_s16  ;;  %s401_s15 = sshll.u32 %s643_s10, 1 }
  0x16   : > { %424 = vmatpush1.bf16.msra.mxu0 %v423_v21  ;;  %464 = vmatpush1.bf16.msra.mxu1 %v423_v21  ;;  %s141_s18 = scalar_lea.vmem %s641_s2, %s401_s15 }
  0x17   : > { %425 = vmatprep.subr.bf16.mxu0 %v499_v12  ;;  %453 = vmatprep.subr.bf16.mxu1 %v499_v12 }
  0x19   : > { %185 = vrot.lane.b32.xlu1 %v407_v7, %s498_s17  ;;  %183 = vrot.lane.b32.xlu0 %v406_v8, %s498_s17 }
  0x1a   : > { %427 = vmatpush1.bf16.msra.mxu0 %v426_v24  ;;  %465 = vmatpush1.bf16.msra.mxu1 %v426_v24 }
  0x1b   : > { %428 = vmatprep.subr.bf16.mxu0 %v499_v12  ;;  %454 = vmatprep.subr.bf16.mxu1 %v499_v12 }
  0x1e   : > { %430 = vmatpush1.bf16.msra.mxu0 %v429_v27  ;;  %466 = vmatpush1.bf16.msra.mxu1 %v429_v27 }
  0x1f   : > { %431 = vmatprep.subr.bf16.mxu0 %v499_v12  ;;  %455 = vmatprep.subr.bf16.mxu1 %v499_v12 }
  0x22   : > { %433 = vmatpush1.bf16.msra.mxu0 %v432_v30  ;;  %467 = vmatpush1.bf16.msra.mxu1 %v432_v30 }
  0x23   : > { %434 = vmatprep.subr.bf16.mxu0 %v499_v12  ;;  %456 = vmatprep.subr.bf16.mxu1 %v499_v12 }
  0x26   : > { %436 = vmatpush1.bf16.msra.mxu0 %v435_v33  ;;  %468 = vmatpush1.bf16.msra.mxu1 %v435_v33 }
  0x27   : > { %437 = vmatprep.subr.bf16.mxu0 %v499_v12  ;;  %457 = vmatprep.subr.bf16.mxu1 %v499_v12 }
  0x2a   : > { %439 = vmatpush1.bf16.msra.mxu0 %v438_v36  ;;  %469 = vmatpush1.bf16.msra.mxu1 %v438_v36 }
  0x2b   : > { %440 = vmatprep.subr.bf16.mxu0 %v499_v12  ;;  %458 = vmatprep.subr.bf16.mxu1 %v499_v12 }
  0x2e   : > { %442 = vmatpush1.bf16.msra.mxu0 %v441_v39  ;;  %470 = vmatpush1.bf16.msra.mxu1 %v441_v39 }
  0x2f   : > { %443 = vmatprep.subr.bf16.mxu0 %v499_v12  ;;  %459 = vmatprep.subr.bf16.mxu1 %v499_v12 }
  0x32   : > { %445 = vmatpush1.bf16.msra.mxu0 %v444_v46  ;;  %471 = vmatpush1.bf16.msra.mxu1 %v444_v46 }
  0x33   : > { %446 = vmatprep.subr.bf16.mxu0 %v499_v12  ;;  %460 = vmatprep.subr.bf16.mxu1 %v499_v12 }
  0x36   : > { %448 = vmatpush1.bf16.msra.mxu0 %v447_v49  ;;  %472 = vmatpush1.bf16.msra.mxu1 %v447_v49 }
  0x83   : > { %v170_v40 = vpop.permute.xlu1 %169  ;;  %v156_v41 = vpop.permute.xlu0 %155 }
  0x84   : > { %162 = vst.msk [vmem:[#allocation2 + $0x1] sm:$0xff] %vm161_vm2, %v156_v41 }
  0x85   : > { %176 = vst.msk [vmem:[#allocation2 + $0x1] sm:$0xff] %vm175_vm3, %v170_v40 }
  0x87   : > { %v172_v44 = vpop.permute.xlu1 %171  ;;  %v158_v45 = vpop.permute.xlu0 %157 }
  0x88   : > { %163 = vst.msk [vmem:[#allocation2 + $0x9] sm:$0xff] %vm161_vm2, %v158_v45 }
  0x89   : > { %177 = vst.msk [vmem:[#allocation2 + $0x9] sm:$0xff] %vm175_vm3, %v172_v44 }
  0x8b   : > { %v186_v50 = vpop.permute.xlu1 %185  ;;  %v184_v51 = vpop.permute.xlu0 %183 }
  0x8c   : > { %191 = vst.msk [vmem:[#allocation2 + $0x9] sm:$0xff] %vm189_vm4, %v186_v50  ;;  %190 = vst.msk [vmem:[#allocation2 + $0x1] sm:$0xff] %vm189_vm4, %v184_v51 }
  0x93   : > { %v198_v52 = vld [vmem:[#allocation2 + $0x9] sm:$0xff]  ;;  %v197_v53 = vld [vmem:[#allocation2 + $0x1] sm:$0xff] }
  0x94   : > { %v210_v54 = vld [vmem:[#allocation2 + $0x2] sm:$0xff]  ;;  %203 = vrot.lane.b32.xlu1 %v198_v52, %s500_s14  ;;  %201 = vrot.lane.b32.xlu0 %v197_v53, %s500_s14  ;;  %v211_v55 = vld [vmem:[#allocation2 + $0xa] sm:$0xff] }
  0x95   : > { %212 = vst.msk [vmem:[#allocation3 + $0x8] sm:$0xff] %vm194_vm5, %v210_v54  ;;  %v193_v56 = vld [vmem:[#allocation2 + $0x8] sm:$0xff]  ;;  %v192_v57 = vld [vmem:[#allocation2] sm:$0xff]  ;;  %213 = vst.msk [vmem:[#allocation3 + $0x18] sm:$0xff] %vm194_vm5, %v211_v55 }
  0x96   : > { %196 = vst.msk [vmem:[#allocation3 + $0x10] sm:$0xff] %vm194_vm5, %v193_v56  ;;  %195 = vst.msk [vmem:[#allocation3] sm:$0xff] %vm194_vm5, %v192_v57 }
  0x9c   : > { %v215_v58 = vld [vmem:[#allocation3 + $0x8] sm:$0xff]  ;;  %v217_v59 = vld [vmem:[#allocation3 + $0x18] sm:$0xff] }
  0x9d   : > { %408 = vmatprep.mubr.msk.f32.mxu0 %vm194_vm5, %v215_v58  ;;  %409 = vmatprep.mubr.msk.f32.mxu1 %vm194_vm5, %v217_v59 }
 0x106   : > { %v204_v60 = vpop.permute.xlu1 %203  ;;  %v202_v61 = vpop.permute.xlu0 %201 }
 0x107   : > { %209 = vst.msk [vmem:[#allocation3 + $0x10] sm:$0xff] %vm207_vm6, %v204_v60  ;;  %208 = vst.msk [vmem:[#allocation3] sm:$0xff] %vm207_vm6, %v202_v61 }
 0x10e   : > { %v214_v62 = vld [vmem:[#allocation3] sm:$0xff]  ;;  %v216_v63 = vld [vmem:[#allocation3 + $0x10] sm:$0xff] }
 0x10f   : > { %313 = vmatmul.mubr.f32.vlgmr.msra.gmra.mrb[0].mxu0 %v214_v62  ;;  %318 = vmatmul.mubr.f32.vlgmr.msra.gmra.mrb[0].mxu1 %v216_v63 }
 0x1e2   : > { %v314_v0 = vpop.f32.mrb[0].mxu0  ;;  %v319_v1 = vpop.f32.mrb[0].mxu1 }
 0x1e3   : > { %v331_v2 = vmul.f32 %v314_v0, %v314_v0  ;;  %v323_v3 = vadd.f32 %v319_v1, %v314_v0  ;;  %v332_v4 = vmul.f32 %v319_v1, %v319_v1  ;;  %v316_v5 = vpop.f32.mrb[1].mxu0  ;;  %v321_v6 = vpop.f32.mrb[1].mxu1 }
 0x1e5   : > { %v324_v7 = vrot.slane %v323_v3, 4  ;;  %v333_v8 = vadd.f32 %v332_v4, %v331_v2 }
 0x1e7   : > { %v325_v9 = vadd.f32 %v324_v7, %v323_v3  ;;  %v334_v10 = vrot.slane %v333_v8, 4 }
 0x1e9   : > { %v326_v11 = vrot.slane %v325_v9, 2  ;;  %v335_v12 = vadd.f32 %v334_v10, %v333_v8 }
 0x1eb   : > { %v327_v13 = vadd.f32 %v326_v11, %v325_v9  ;;  %v336_v14 = vrot.slane %v335_v12, 2 }
 0x1ed   : > { %v328_v15 = vrot.slane %v327_v13, 1  ;;  %v337_v16 = vadd.f32 %v336_v14, %v335_v12 }
 0x1ef   : > { %v329_v17 = vadd.f32 %v328_v15, %v327_v13  ;;  %v338_v18 = vrot.slane %v337_v16, 1 }
 0x1f1   : > { %330 = vst [vmem:[%s141_s18] sm:$0x1] %v329_v17  ;;  %v339_v19 = vadd.f32 %v338_v18, %v337_v16 }
 0x1f3   : > { %340 = vst [vmem:[%s141_s18 + $0x1] sm:$0x1] %v339_v19 }
 0x1f4 PF: > { %s12_s9 = sadd.s32 1, %s493_s9  }
 0x1f5   : > { %p9_p4 = scmp.ge.s32.totalorder %s12_s9, 4  }
 0x1f7   :  { %11 = sbr.rel (!%p9_p4) target bundleno = 1 (0x1), region = 61 }

// kernel: tile.17
= control target key start
LH: loop header
LB: loop body
LE: loop exit
PB: predicated region body
PF: predicated region fallthrough
CT: control target
= control target key end

     0   :  { %s28_s0 = inlined_call_operand.vmem [shape: f32[8], index: 0, kind: input, shape index: {}]   ;;  %s29_s1 = inlined_call_operand.vmem [shape: f32[16,8], index: 1, kind: output, shape index: {}]  }
   0x1   :  { %v4_v0 = vld [vmem:[%s28_s0] ss:$0 sm:$0xff] }
   0x2   :  { %5 = vst [vmem:[%s29_s1] sm:$0xff] %v4_v0  ;;  %8 = vst [vmem:[%s29_s1 + $0x8] sm:$0xff] %v4_v0 }

// kernel: tile.25
= control target key start
LH: loop header
LB: loop body
LE: loop exit
PB: predicated region body
PF: predicated region fallthrough
CT: control target
= control target key end

     0   :  { %s131_s10 = smov 120   ;;  %s132_s11 = smov 104   ;;  %vm3_vm0 = vcmask 64512   ;;  %vm9_vm1 = vcmask 1048512   ;;  %vm15_vm2 = vcmask 982912   ;;  %vm21_vm3 = vcmask 917312   ;;  %s207_s0 = inlined_call_operand.vmem [shape: f32[16,8], index: 0, kind: input, shape index: {}]   ;;  %s208_s1 = inlined_call_operand.vmem [shape: f32[1,128], index: 1, kind: output, shape index: {}]  }
   0x1   :  { %v101_v0 = vld [vmem:[%s207_s0 + $0xf] sm:$0x1]   ;;  %v103_v1 = vld [vmem:[%s207_s0 + $0xd] sm:$0x1]   ;;  %v102_v2 = vld [vmem:[%s207_s0 + $0xe] sm:$0x1]  }
   0x2   :  { %7 = vrot.lane.b32.xlu0 %v101_v0, %s131_s10  ;;  %19 = vrot.lane.b32.xlu1 %v103_v1, %s132_s11  ;;  %v104_v3 = vld [vmem:[%s207_s0 + $0xc] sm:$0x1]   ;;  %s133_s16 = smov 112   ;;  %s134_s17 = smov 96   ;;  %v105_v4 = vld [vmem:[%s207_s0 + $0xb] sm:$0x1]  }
   0x3   :  { %v106_v5 = vld [vmem:[%s207_s0 + $0xa] sm:$0x1]   ;;  %v2_v6 = vld [vmem:[%s207_s0] sm:$0x1]   ;;  %s135_s24 = smov 88   ;;  %s136_s25 = smov 80  }
   0x4   :  { %4 = vst.msk [vmem:[#allocation0] sm:$0x1] %vm3_vm0, %v2_v6   ;;  %v107_v7 = vld [vmem:[%s207_s0 + $0x9] sm:$0x1]   ;;  %v108_v8 = vld [vmem:[%s207_s0 + $0x8] sm:$0x1]  }
   0x5   :  { %s137_s30 = smov 72   ;;  %s138_s2 = smov 64   ;;  %v109_v9 = vld [vmem:[%s207_s0 + $0x7] sm:$0x1]   ;;  %v110_v10 = vld [vmem:[%s207_s0 + $0x6] sm:$0x1]  }
   0x6   :  { %13 = vrot.lane.b32.xlu0 %v102_v2, %s133_s16  ;;  %25 = vrot.lane.b32.xlu1 %v104_v3, %s134_s17  ;;  %s139_s7 = smov 56   ;;  %s140_s8 = smov 48   ;;  %v111_v11 = vld [vmem:[%s207_s0 + $0x5] sm:$0x1]   ;;  %v112_v12 = vld [vmem:[%s207_s0 + $0x4] sm:$0x1]  }
   0x7   :  { %s141_s13 = smov 40   ;;  %s142_s14 = smov 32   ;;  %v113_v13 = vld [vmem:[%s207_s0 + $0x3] sm:$0x1]   ;;  %v114_v14 = vld [vmem:[%s207_s0 + $0x2] sm:$0x1]  }
   0x8   :  { %s143_s19 = smov 24   ;;  %s144_s20 = smov 16   ;;  %v115_v15 = vld [vmem:[%s207_s0 + $0x1] sm:$0x1]   ;;  %vm27_vm4 = vcmask 851712   ;;  %vm33_vm5 = vcmask 786112  }
   0x9   :  { %s145_s0 = smov 8   ;;  %vm39_vm6 = vcmask 720512   ;;  %vm45_vm7 = vcmask 654912   ;;  %vm51_vm8 = vcmask 589312   ;;  %vm57_vm9 = vcmask 523712  }
   0xa   :  { %31 = vrot.lane.b32.xlu0 %v105_v4, %s135_s24  ;;  %37 = vrot.lane.b32.xlu1 %v106_v5, %s136_s25  ;;  %vm63_vm10 = vcmask 458112   ;;  %vm69_vm11 = vcmask 392512   ;;  %vm75_vm12 = vcmask 326912   ;;  %vm81_vm13 = vcmask 261312  }
   0xb   :  { %vm87_vm14 = vcmask 195712   ;;  %vm93_vm15 = vcmask 130112  }
   0xe   :  { %43 = vrot.lane.b32.xlu0 %v107_v7, %s137_s30  ;;  %49 = vrot.lane.b32.xlu1 %v108_v8, %s138_s2 }
  0x12   :  { %55 = vrot.lane.b32.xlu0 %v109_v9, %s139_s7  ;;  %61 = vrot.lane.b32.xlu1 %v110_v10, %s140_s8 }
  0x16   :  { %67 = vrot.lane.b32.xlu0 %v111_v11, %s141_s13  ;;  %73 = vrot.lane.b32.xlu1 %v112_v12, %s142_s14 }
  0x1a   :  { %79 = vrot.lane.b32.xlu0 %v113_v13, %s143_s19  ;;  %85 = vrot.lane.b32.xlu1 %v114_v14, %s144_s20 }
  0x1e   :  { %91 = vrot.lane.b32.xlu0 %v115_v15, %s145_s0 }
  0x74   :  { %v8_v16 = vpop.permute.xlu0 %7   ;;  %v20_v17 = vpop.permute.xlu1 %19  }
  0x75   :  { %10 = vst.msk [vmem:[#allocation0] sm:$0x1] %vm9_vm1, %v8_v16  }
  0x78   :  { %v14_v18 = vpop.permute.xlu0 %13   ;;  %v26_v19 = vpop.permute.xlu1 %25  }
  0x79   :  { %16 = vst.msk [vmem:[#allocation0] sm:$0x1] %vm15_vm2, %v14_v18  }
  0x7a   :  { %22 = vst.msk [vmem:[#allocation0] sm:$0x1] %vm21_vm3, %v20_v17  }
  0x7b   :  { %28 = vst.msk [vmem:[#allocation0] sm:$0x1] %vm27_vm4, %v26_v19  }
  0x7c   :  { %v32_v20 = vpop.permute.xlu0 %31   ;;  %v38_v21 = vpop.permute.xlu1 %37  }
  0x7d   :  { %34 = vst.msk [vmem:[#allocation0] sm:$0x1] %vm33_vm5, %v32_v20  }
  0x7e   :  { %40 = vst.msk [vmem:[#allocation0] sm:$0x1] %vm39_vm6, %v38_v21  }
  0x80   :  { %v44_v22 = vpop.permute.xlu0 %43   ;;  %v50_v23 = vpop.permute.xlu1 %49  }
  0x81   :  { %46 = vst.msk [vmem:[#allocation0] sm:$0x1] %vm45_vm7, %v44_v22  }
  0x82   :  { %52 = vst.msk [vmem:[#allocation0] sm:$0x1] %vm51_vm8, %v50_v23  }
  0x84   :  { %v56_v24 = vpop.permute.xlu0 %55   ;;  %v62_v25 = vpop.permute.xlu1 %61  }
  0x85   :  { %58 = vst.msk [vmem:[#allocation0] sm:$0x1] %vm57_vm9, %v56_v24  }
  0x86   :  { %64 = vst.msk [vmem:[#allocation0] sm:$0x1] %vm63_vm10, %v62_v25  }
  0x88   :  { %v68_v26 = vpop.permute.xlu0 %67   ;;  %v74_v27 = vpop.permute.xlu1 %73  }
  0x89   :  { %70 = vst.msk [vmem:[#allocation0] sm:$0x1] %vm69_vm11, %v68_v26  }
  0x8a   :  { %76 = vst.msk [vmem:[#allocation0] sm:$0x1] %vm75_vm12, %v74_v27  }
  0x8c   :  { %v80_v28 = vpop.permute.xlu0 %79   ;;  %v86_v29 = vpop.permute.xlu1 %85  }
  0x8d   :  { %82 = vst.msk [vmem:[#allocation0] sm:$0x1] %vm81_vm13, %v80_v28  }
  0x8e   :  { %88 = vst.msk [vmem:[#allocation0] sm:$0x1] %vm87_vm14, %v86_v29  }
  0x90   :  { %v92_v30 = vpop.permute.xlu0 %91  }
  0x91   :  { %94 = vst.msk [vmem:[#allocation0] sm:$0x1] %vm93_vm15, %v92_v30  }
  0x98   :  { %v98_v31 = vld [vmem:[#allocation0] sm:$0x1] }
  0x99   :  { %100 = vst [vmem:[%s208_s1] sm:$0x1] %v98_v31 }

// kernel: conv_skip_block_b.3
= control target key start
LH: loop header
LB: loop body
LE: loop exit
PB: predicated region body
PF: predicated region fallthrough
CT: control target
= control target key end

     0   :  { %s717_s15 = smov 0   ;;  %s868_s0 = inlined_call_operand.vmem [shape: f32[2,4,16,16], index: 0, kind: input, shape index: {}]   ;;  %s869_s1 = inlined_call_operand.vmem [shape: f32[192,128], index: 1, kind: input, shape index: {}]   ;;  %s870_s2 = inlined_call_operand.vmem [shape: f32[64,128], index: 2, kind: input, shape index: {}]   ;;  %s871_s3 = inlined_call_operand.vmem [shape: f32[3,128], index: 3, kind: input, shape index: {}]   ;;  %s872_s4 = inlined_call_operand.vmem [shape: f32[32,128], index: 4, kind: output, shape index: {}]  }
   0x1 LB: > { %s723_s16 = sadd.s32 4294967295, %s684_s15   ;;  %p562_p0 = scmp.ge.s32.totalorder %s684_s15, 1  ;;  %s684_s15 = sphi %s717_s15, %s14_s15  }
   0x2   : > { %p162_p1 = scmp.lt.s32.totalorder %s684_s15, 3 }
   0x4   : > { %p163_p2 = pnand %p562_p0, %p162_p1 }
   0x5   : > { %p188_p3 = scmp.lt.s32.totalorder (!%p163_p2), %s723_s16, 1  ;;  %vm199_vm0 = vcmask (!%p163_p2), 516096   ;;  %v686_v0 = vmov (!%p163_p2), 0.0   ;;  %vm204_vm1 = vcmask (!%p163_p2), 130048   ;;  %s687_s22 = smov (!%p163_p2), 32   ;;  %v275_v9 = vld [vmem:[%s869_s1] sm:$0xff] (!%p163_p2) }
   0x6   : > { %166 = sbr.rel (%p163_p2) target bundleno = 608 (0x260), region = 36  ;;  %201 = vst.msk [vmem:[#allocation2 + $0x11] sm:$0x1] (!%p163_p2), %vm199_vm0, %v686_v0  ;;  %200 = vst.msk [vmem:[#allocation2] sm:$0x1] (!%p163_p2), %vm199_vm0, %v686_v0  ;;  %s688_s23 = smov (!%p163_p2), 16  }
   0x7   : > { %s689_s24 = smov (!%p163_p2), 48   ;;  %v276_v10 = vld [vmem:[%s869_s1 + $0x8] sm:$0xff] (!%p163_p2)  ;;  %v277_v11 = vld [vmem:[%s869_s1 + $0x10] sm:$0xff] (!%p163_p2)  ;;  %v690_v12 = vmov (!%p163_p2), 0.0|0.0   ;;  %v278_v14 = vld [vmem:[%s869_s1 + $0x18] sm:$0xff] (!%p163_p2)  ;;  %vm218_vm2 = vcmask (!%p163_p2), 261248  }
   0x8   : > { %612 = vmatprep.subr.bf16.mxu0 (!%p163_p2), %v690_v12  ;;  %v613_v13 = vpack.c.bf16 (!%p163_p2), %v276_v10, %v275_v9  ;;  %v616_v15 = vpack.c.bf16 (!%p163_p2), %v278_v14, %v277_v11  ;;  %v279_v16 = vld [vmem:[%s869_s1 + $0x20] sm:$0xff] (!%p163_p2)  ;;  %v280_v17 = vld [vmem:[%s869_s1 + $0x28] sm:$0xff] (!%p163_p2)  ;;  %v281_v19 = vld [vmem:[%s869_s1 + $0x30] sm:$0xff] (!%p163_p2)  ;;  %vm232_vm3 = vcmask (!%p163_p2), 392448   ;;  %vm246_vm4 = vcmask (!%p163_p2), 523648   ;;  %s691_s25 = smov (!%p163_p2), 64  }
   0x9   : > { %v619_v18 = vpack.c.bf16 (!%p163_p2), %v280_v17, %v279_v16  ;;  %v282_v20 = vld [vmem:[%s869_s1 + $0x38] sm:$0xff] (!%p163_p2)  ;;  %v283_v22 = vld [vmem:[%s869_s1 + $0x40] sm:$0xff] (!%p163_p2)  ;;  %v284_v23 = vld [vmem:[%s869_s1 + $0x48] sm:$0xff] (!%p163_p2)  ;;  %vm251_vm5 = vcmask (!%p163_p2), 523264   ;;  %vm264_vm6 = vcmask (!%p163_p2), 1048064  }
   0xa   : > { %614 = vmatpush1.bf16.msra.mxu0 (!%p163_p2), %v613_v13  ;;  %v622_v21 = vpack.c.bf16 (!%p163_p2), %v282_v20, %v281_v19  ;;  %v625_v24 = vpack.c.bf16 (!%p163_p2), %v284_v23, %v283_v22  ;;  %v285_v25 = vld [vmem:[%s869_s1 + $0x50] sm:$0xff] (!%p163_p2)  ;;  %v286_v26 = vld [vmem:[%s869_s1 + $0x58] sm:$0xff] (!%p163_p2)  ;;  %v287_v28 = vld [vmem:[%s869_s1 + $0x60] sm:$0xff] (!%p163_p2) }
   0xb   : > { %615 = vmatprep.subr.bf16.mxu0 (!%p163_p2), %v690_v12  ;;  %v628_v27 = vpack.c.bf16 (!%p163_p2), %v286_v26, %v285_v25  ;;  %v288_v29 = vld [vmem:[%s869_s1 + $0x68] sm:$0xff] (!%p163_p2)  ;;  %v289_v31 = vld [vmem:[%s869_s1 + $0x70] sm:$0xff] (!%p163_p2)  ;;  %v290_v32 = vld [vmem:[%s869_s1 + $0x78] sm:$0xff] (!%p163_p2) }
   0xc   : > { %v631_v30 = vpack.c.bf16 (!%p163_p2), %v288_v29, %v287_v28  ;;  %v634_v33 = vpack.c.bf16 (!%p163_p2), %v290_v32, %v289_v31  ;;  %v291_v34 = vld [vmem:[%s869_s1 + $0x80] sm:$0xff] (!%p163_p2)  ;;  %v292_v35 = vld [vmem:[%s869_s1 + $0x88] sm:$0xff] (!%p163_p2)  ;;  %v293_v37 = vld [vmem:[%s869_s1 + $0x90] sm:$0xff] (!%p163_p2) }
   0xd   : > { %s189_s17 = scalar_select %p188_p3, %s723_s16, 1  ;;  %v637_v36 = vpack.c.bf16 %v292_v35, %v291_v34  ;;  %v294_v38 = vld [vmem:[%s869_s1 + $0x98] sm:$0xff]  ;;  %v295_v42 = vld [vmem:[%s869_s1 + $0xa0] sm:$0xff]  ;;  %v296_v43 = vld [vmem:[%s869_s1 + $0xa8] sm:$0xff] }
   0xe   : > { %617 = vmatpush1.bf16.msra.mxu0 %v616_v15  ;;  %v640_v39 = vpack.c.bf16 %v294_v38, %v293_v37  ;;  %v643_v46 = vpack.c.bf16 %v296_v43, %v295_v42  ;;  %v297_v47 = vld [vmem:[%s869_s1 + $0xb0] sm:$0xff]  ;;  %v298_v48 = vld [vmem:[%s869_s1 + $0xb8] sm:$0xff]  ;;  %v382_v58 = vld [vmem:[%s870_s2] sm:$0xff] }
   0xf   : > { %s582_s18 = sshll.u32 %s189_s17, 6  ;;  %618 = vmatprep.subr.bf16.mxu0 %v690_v12  ;;  %v646_v49 = vpack.c.bf16 %v298_v48, %v297_v47  ;;  %v383_v59 = vld [vmem:[%s870_s2 + $0x8] sm:$0xff]  ;;  %v384_v60 = vld [vmem:[%s870_s2 + $0x10] sm:$0xff]  ;;  %v385_v62 = vld [vmem:[%s870_s2 + $0x18] sm:$0xff] }
  0x10   : > { %s192_s21 = scalar_lea.vmem %s868_s0, %s582_s18  ;;  %v648_v61 = vpack.c.bf16 %v383_v59, %v382_v58  ;;  %v652_v63 = vpack.c.bf16 %v385_v62, %v384_v60  ;;  %v386_v0 = vld [vmem:[%s870_s2 + $0x20] sm:$0xff]  ;;  %s565_s18 = sshll.u32 %s723_s16, 1 }
  0x11   : > { %v569_v1 = vld [vmem:[%s192_s21 + $0x20] sm:$0xff]  ;;  %v567_v2 = vld [vmem:[%s192_s21 + $0x10] sm:$0xff]  ;;  %v570_v3 = vld [vmem:[%s192_s21 + $0x28] sm:$0xff]  ;;  %p194_p4 = scmp.lt.s32.totalorder %s565_s18, 3 }
  0x12   : > { %226 = vrot.lane.b32.xlu1 %v569_v1, %s687_s22  ;;  %212 = vrot.lane.b32.xlu0 %v567_v2, %s688_s23  ;;  %v568_v4 = vld [vmem:[%s192_s21 + $0x18] sm:$0xff]  ;;  %v202_v5 = vld [vmem:[%s192_s21] sm:$0xff] }
  0x13   : > { %v203_v6 = vld [vmem:[%s192_s21 + $0x8] sm:$0xff]  ;;  %205 = vst.msk [vmem:[#allocation2 + $0x1] sm:$0xff] %vm204_vm1, %v202_v5  ;;  %v572_v7 = vld [vmem:[%s192_s21 + $0x38] sm:$0xff]  ;;  %v571_v8 = vld [vmem:[%s192_s21 + $0x30] sm:$0xff]  ;;  %620 = vmatpush1.bf16.msra.mxu0 %v619_v18  ;;  %649 = vmatprep.subr.bf16.mxu1 %v648_v61  ;;  %s874_s18 = smov (!%p194_p4, %s565_s18), 3 }
  0x14   : > { %206 = vst.msk [vmem:[#allocation2 + $0x9] sm:$0xff] %vm204_vm1, %v203_v6  ;;  %621 = vmatprep.subr.bf16.mxu0 %v690_v12  ;;  %v387_v1 = vld [vmem:[%s870_s2 + $0x28] sm:$0xff]  ;;  %651 = vmatpush3.bf16.msra.mxu1 %v648_v61  ;;  %v389_v5 = vld [vmem:[%s870_s2 + $0x38] sm:$0xff]  ;;  %v575_v18 = vld [vmem:[%s871_s3] ss:$0 sm:$0xff]  ;;  %s566_s16 = sshll.u32 %s874_s18, 3 }
  0x15   : > { %653 = vmatprep.subr.bf16.mxu1 %v652_v63  ;;  %v656_v2 = vpack.c.bf16 %v387_v1, %v386_v0  ;;  %v577_v22 = vld [vmem:[%s871_s3 + $0x2] ss:$0 sm:$0xff]  ;;  %s197_s27 = scalar_lea.vmem %s872_s4, %s566_s16 }
  0x16   : > { %228 = vrot.lane.b32.xlu1 %v570_v3, %s687_s22  ;;  %214 = vrot.lane.b32.xlu0 %v568_v4, %s688_s23  ;;  %v388_v4 = vld [vmem:[%s870_s2 + $0x30] sm:$0xff] }
  0x17   : > { %623 = vmatpush1.bf16.msra.mxu0 %v622_v21  ;;  %v660_v6 = vpack.c.bf16 %v389_v5, %v388_v4  ;;  %v576_v21 = vld [vmem:[%s871_s3 + $0x1] ss:$0 sm:$0xff] }
  0x18   : > { %624 = vmatprep.subr.bf16.mxu0 %v690_v12  ;;  %655 = vmatpush3.bf16.msra.mxu1 %v652_v63 }
  0x19   : > { %657 = vmatprep.subr.bf16.mxu1 %v656_v2 }
  0x1a   : > { %242 = vrot.lane.b32.xlu1 %v572_v7, %s689_s24  ;;  %240 = vrot.lane.b32.xlu0 %v571_v8, %s689_s24 }
  0x1b   : > { %626 = vmatpush1.bf16.msra.mxu0 %v625_v24 }
  0x1c   : > { %627 = vmatprep.subr.bf16.mxu0 %v690_v12  ;;  %659 = vmatpush3.bf16.msra.mxu1 %v656_v2 }
  0x1d   : > { %661 = vmatprep.subr.bf16.mxu1 %v660_v6 }
  0x1f   : > { %629 = vmatpush1.bf16.msra.mxu0 %v628_v27 }
  0x20   : > { %630 = vmatprep.subr.bf16.mxu0 %v690_v12  ;;  %663 = vmatpush3.bf16.msra.mxu1 %v660_v6 }
  0x23   : > { %632 = vmatpush1.bf16.msra.mxu0 %v631_v30 }
  0x24   : > { %633 = vmatprep.subr.bf16.mxu0 %v690_v12 }
  0x27   : > { %635 = vmatpush1.bf16.msra.mxu0 %v634_v33 }
  0x28   : > { %636 = vmatprep.subr.bf16.mxu0 %v690_v12 }
  0x2b   : > { %638 = vmatpush1.bf16.msra.mxu0 %v637_v36 }
  0x2c   : > { %639 = vmatprep.subr.bf16.mxu0 %v690_v12 }
  0x2f   : > { %641 = vmatpush1.bf16.msra.mxu0 %v640_v39 }
  0x30   : > { %642 = vmatprep.subr.bf16.mxu0 %v690_v12 }
  0x33   : > { %644 = vmatpush1.bf16.msra.mxu0 %v643_v46 }
  0x34   : > { %645 = vmatprep.subr.bf16.mxu0 %v690_v12 }
  0x37   : > { %647 = vmatpush1.bf16.msra.mxu0 %v646_v49 }
  0x84   : > { %v227_v40 = vpop.permute.xlu1 %226  ;;  %v213_v41 = vpop.permute.xlu0 %212 }
  0x85   : > { %219 = vst.msk [vmem:[#allocation2 + $0x1] sm:$0xff] %vm218_vm2, %v213_v41 }
  0x86   : > { %233 = vst.msk [vmem:[#allocation2 + $0x1] sm:$0xff] %vm232_vm3, %v227_v40 }
  0x88   : > { %v229_v44 = vpop.permute.xlu1 %228  ;;  %v215_v45 = vpop.permute.xlu0 %214 }
  0x89   : > { %220 = vst.msk [vmem:[#allocation2 + $0x9] sm:$0xff] %vm218_vm2, %v215_v45 }
  0x8a   : > { %234 = vst.msk [vmem:[#allocation2 + $0x9] sm:$0xff] %vm232_vm3, %v229_v44 }
  0x8c   : > { %v243_v50 = vpop.permute.xlu1 %242  ;;  %v241_v51 = vpop.permute.xlu0 %240 }
  0x8d   : > { %248 = vst.msk [vmem:[#allocation2 + $0x9] sm:$0xff] %vm246_vm4, %v243_v50  ;;  %247 = vst.msk [vmem:[#allocation2 + $0x1] sm:$0xff] %vm246_vm4, %v241_v51 }
  0x94   : > { %v254_v52 = vld [vmem:[#allocation2 + $0x1] sm:$0xff]  ;;  %v255_v53 = vld [vmem:[#allocation2 + $0x9] sm:$0xff] }
  0x95   : > { %v267_v54 = vld [vmem:[#allocation2 + $0x2] sm:$0xff]  ;;  %258 = vrot.lane.b32.xlu0 %v254_v52, %s691_s25  ;;  %260 = vrot.lane.b32.xlu1 %v255_v53, %s691_s25  ;;  %v268_v55 = vld [vmem:[#allocation2 + $0xa] sm:$0xff] }
  0x96   : > { %269 = vst.msk [vmem:[#allocation3 + $0x8] sm:$0xff] %vm251_vm5, %v267_v54  ;;  %v249_v56 = vld [vmem:[#allocation2] sm:$0xff]  ;;  %v250_v57 = vld [vmem:[#allocation2 + $0x8] sm:$0xff]  ;;  %270 = vst.msk [vmem:[#allocation3 + $0x18] sm:$0xff] %vm251_vm5, %v268_v55 }
  0x97   : > { %252 = vst.msk [vmem:[#allocation3] sm:$0xff] %vm251_vm5, %v249_v56  ;;  %253 = vst.msk [vmem:[#allocation3 + $0x10] sm:$0xff] %vm251_vm5, %v250_v57 }
  0x9d   : > { %v272_v3 = vld [vmem:[#allocation3 + $0x8] sm:$0xff]  ;;  %v274_v11 = vld [vmem:[#allocation3 + $0x18] sm:$0xff] }
  0x9e   : > { %573 = vmatprep.mubr.msk.f32.mxu0 %vm251_vm5, %v272_v3 }
 0x107   : > { %v259_v7 = vpop.permute.xlu0 %258  ;;  %v261_v8 = vpop.permute.xlu1 %260 }
 0x108   : > { %265 = vst.msk [vmem:[#allocation3] sm:$0xff] %vm264_vm6, %v259_v7  ;;  %266 = vst.msk [vmem:[#allocation3 + $0x10] sm:$0xff] %vm264_vm6, %v261_v8 }
 0x10f   : > { %v380_v9 = vld [vmem:[#allocation3] sm:$0xff]  ;;  %v381_v10 = vld [vmem:[#allocation3 + $0x10] sm:$0xff] }
 0x110   : > { %413 = vrot.lane.b32.xlu0 %v380_v9, %s691_s25  ;;  %370 = vmatmul.mubr.f32.vlgmr.msra.gmra.mrb[0].mxu0 %v380_v9 }
 0x111   : > { %415 = vrot.lane.b32.xlu1 %v381_v10, %s691_s25  ;;  %574 = vmatprep.mubr.msk.f32.mxu0 %vm251_vm5, %v274_v11 }
 0x114   : > { %375 = vmatmul.mubr.f32.gmra.mrb[2].mxu0 %v381_v10 }
 0x182   : > { %v414_v12 = vpop.permute.xlu0 %413 }
 0x183   : > { %v416_v13 = vpop.permute.xlu1 %415  ;;  %609 = vmatprep.mubr.msk.f32.mxu1 %vm251_vm5, %v414_v12 }
 0x184   : > { %610 = vmatmul.mubr.msk.f32.vlgmr.msra.gmra.mrb[0].mxu1 %vm251_vm5, %v416_v13 }
 0x1e3   : > { %v371_v14 = vpop.f32.mrb[0].mxu0 }
 0x1e4   : > { %v373_v15 = vpop.f32.mrb[1].mxu0  ;;  %v395_v20 = vmul.f32 %v575_v18, %v371_v14 }
 0x1e6   : > { %v402_v24 = vadd.f32 %v576_v21, %v395_v20 }
 0x1e7   : > { %v376_v16 = vpop.f32.mrb[2].mxu0 }
 0x1e8   : > { %v378_v17 = vpop.f32.mrb[3].mxu0  ;;  %v396_v19 = vmul.f32 %v575_v18, %v376_v16  ;;  %v404_v31 = vmax.f32 %v402_v24, 0.0 }
 0x1ea   : > { %v403_v23 = vadd.f32 %v576_v21, %v396_v19 }
 0x1ec   : > { %v405_v29 = vmax.f32 %v403_v23, 0.0 }
 0x257   : > { %v611_v25 = vpop.f32.mrb[0].mxu1 }
 0x258   : > { %v493_v26 = vadd.f32 %v611_v25, %v577_v22  ;;  %v487_v27 = vpop.f32.mrb[1].mxu1 }
 0x259   : > { %v488_v28 = vadd.f32 %v577_v22, %v487_v27 }
 0x25a   : > { %v497_v30 = vmax.f32 %v493_v26, 0.0 }
 0x25b   : > { %v496_v32 = vmax.f32 %v488_v28, 0.0 }
 0x25c   : > { %v499_v33 = vadd.f32 %v497_v30, %v405_v29 }
 0x25d   : > { %v498_v34 = vadd.f32 %v496_v32, %v404_v31 }
 0x25e   : > { %501 = vst [vmem:[%s197_s27 + $0x8] sm:$0xff] %v499_v33 }
 0x25f   : > { %500 = vst [vmem:[%s197_s27] sm:$0xff] %v498_v34 }
 0x260 PF: > { %s14_s15 = sadd.s32 1, %s684_s15  }
 0x261   : > { %p11_p5 = scmp.ge.s32.totalorder %s14_s15, 4  }
 0x263   :  { %13 = sbr.rel (!%p11_p5) target bundleno = 1 (0x1), region = 69 }

</bundles_post_ra>
